<compile_context>
chip_gen: v7x
topology: tpu7x:2x2x1
jax: 0.10.0
libtpu: 0.0.40
codegen_flags: <defaults>
</compile_context>

<pallas_src>
import functools

import jax
import jax.numpy as jnp
from jax import lax
from jax.experimental import pallas as pl
from jax.experimental.pallas import tpu as pltpu


_LANES = 128
_CHUNK_ROWS = 64          # rows per in-kernel chunk == accumulator-slab rows


def _cdiv(a, b):
    return -(-a // b)


def _combined_loss_kernel(alpha_ref, x_ref, t_ref,
                          facc_ref, iacc_ref, sacc_ref, *,
                          gamma, num_classes, tile_rows, chunk_rows,
                          tiles_per_shard, num_pixels, mask_needed):
    """One (batch, shard, pixel-tile) grid step.

    alpha_ref : (C,) f32 in SMEM                      per-class weights (scalars)
    x_ref     : (1, C, tile_rows, 128) f32/bf16       class probabilities tile
    t_ref     : (1, tile_rows, 128) int8/int32        targets
    *acc_ref  : (1, 1, chunk_rows, 128) f32           per-(batch, shard) partial sums
    """
    s = pl.program_id(1)
    j = pl.program_id(2)

    @pl.when(j == 0)
    def _init():
        facc_ref[...] = jnp.zeros_like(facc_ref)
        iacc_ref[...] = jnp.zeros_like(iacc_ref)
        sacc_ref[...] = jnp.zeros_like(sacc_ref)

    # Hoist SMEM scalar reads and the iota out of the chunk loop.
    alphas = [alpha_ref[c] for c in range(num_classes)]

    logical_tile = s * tiles_per_shard + j   # may point past the last real tile
    if mask_needed:
        offs = (lax.broadcasted_iota(jnp.int32, (chunk_rows, _LANES), 0) * _LANES
                + lax.broadcasted_iota(jnp.int32, (chunk_rows, _LANES), 1))
        tile_pix_base = logical_tile * (tile_rows * _LANES)

    def chunk_body(ci, carry):
        r0 = ci * chunk_rows
        if not isinstance(r0, int):
            r0 = pl.multiple_of(r0, chunk_rows)
        t = t_ref[0, pl.ds(r0, chunk_rows), :].astype(jnp.int32)

        pt = jnp.zeros((chunk_rows, _LANES), jnp.float32)   # x gathered at target class
        at = jnp.zeros((chunk_rows, _LANES), jnp.float32)   # alpha gathered at target class
        xs = None                                           # sum of x over classes (dice)
        # Single fused pass over the (small, static) class axis — no one-hot /
        # MXU.  Class masks are mutually exclusive per pixel, so pt/at use
        # selects instead of add-of-masked; xs must remain an add.
        for c in range(num_classes):
            xc = x_ref[0, c, pl.ds(r0, chunk_rows), :].astype(jnp.float32)
            m = t == c
            pt = jnp.where(m, xc, pt)
            at = jnp.where(m, alphas[c], at)
            xs = xc if xs is None else xs + xc

        log_pt = jnp.log(pt + 1e-10)                 # EUP
        focal = -at * (1.0 - pt) ** gamma * log_pt   # integer gamma -> VPU muls

        focal_v, pt_v, xs_v = focal, pt, xs
        if mask_needed:
            # Zero out pixels that don't exist (column pad / ragged last tile /
            # phantom shard tile).  Selects also squash any garbage read from
            # the uninitialized part of a partial block.
            valid = (offs + (tile_pix_base + ci * (chunk_rows * _LANES))) < num_pixels
            focal_v = jnp.where(valid, focal, 0.0)
            pt_v = jnp.where(valid, pt, 0.0)
            xs_v = jnp.where(valid, xs, 0.0)

        facc_ref[0, 0] += focal_v
        iacc_ref[0, 0] += pt_v
        sacc_ref[0, 0] += xs_v
        return carry

    n_chunks = tile_rows // chunk_rows
    if n_chunks == 1:
        chunk_body(0, None)
    else:
        lax.fori_loop(0, n_chunks, chunk_body, None)


def _choose_tiling(rows, num_classes, itemsize, max_tile_rows=None):
    """Returns (tile_rows, chunk_rows) with tile_rows <= rows (no HBM-side padding)."""
    if rows <= _CHUNK_ROWS:
        return rows, rows                       # single tile, single chunk
    # Aim for ~4 MiB per (double-buffered) x tile -> near the HBM roofline knee.
    target_bytes = 4 << 20
    tr = target_bytes // (_LANES * num_classes * itemsize)
    tr = max(_CHUNK_ROWS, (tr // _CHUNK_ROWS) * _CHUNK_ROWS)
    tr = min(tr, (rows // _CHUNK_ROWS) * _CHUNK_ROWS)
    if max_tile_rows is not None:
        tr = min(tr, max(_CHUNK_ROWS, (max_tile_rows // _CHUNK_ROWS) * _CHUNK_ROWS))
    return tr, _CHUNK_ROWS


def _combined_partial_sums(inputs, targets, alpha, gamma, max_tile_rows=None):
    """Pallas kernel driver. Returns f32 scalars (focal_sum, intersection, input_sum)."""
    B, C, H, W = inputs.shape
    P = H * W

    if isinstance(gamma, float) and float(gamma).is_integer():
        gamma = int(gamma)  # keep the pow as VPU muls (EUP already carries one log/pixel)

    x = inputs.reshape(B, C, P)
    t = targets.reshape(B, P)
    if t.dtype.itemsize != 1:
        # Narrow targets on the wire: 4x less t HBM traffic (biggest win on v5e;
        # the one-time cast amortizes across training steps / fuses upstream).
        t = t.astype(jnp.int8 if C <= 127 else jnp.int32)
    alpha = jnp.asarray(alpha, jnp.float32).reshape(C)

    rows = _cdiv(P, _LANES)
    p_cols = rows * _LANES
    if p_cols != P:
        # TODO(synk): this minimal column pad is the one remaining HBM copy;
        # common segmentation shapes (H*W % 128 == 0) skip it entirely.  Padded
        # pixels are masked out in-kernel, so pad values are irrelevant.
        x = jnp.pad(x, ((0, 0), (0, 0), (0, p_cols - P)))
        t = jnp.pad(t, ((0, 0), (0, p_cols - P)))
    x = x.reshape(B, C, rows, _LANES)      # free reshape (contiguous split)
    t = t.reshape(B, rows, _LANES)

    tr, chunk = _choose_tiling(rows, C, x.dtype.itemsize, max_tile_rows)
    num_tiles = _cdiv(rows, tr)
    # Second parallel axis so both v7x TensorCores stay busy even at B == 1;
    # on single-TC chips it just serializes.
    num_shards = 2 if num_tiles >= 2 else 1
    tiles_per_shard = _cdiv(num_tiles, num_shards)
    grid_tiles = num_shards * tiles_per_shard
    # Mask in-kernel whenever the grid covers pixels that don't exist (column
    # pad, ragged last tile, or a phantom tile introduced by the shard split).
    mask_needed = (grid_tiles * tr * _LANES) != P

    if grid_tiles == num_tiles:
        def x_map(b, s, j): return (b, 0, s * tiles_per_shard + j, 0)
        def t_map(b, s, j): return (b, s * tiles_per_shard + j, 0)
    else:
        # Clamp phantom tiles onto the last real block; their logical pixel
        # indices are >= P so the in-kernel mask zeroes their contribution.
        def x_map(b, s, j):
            return (b, 0, jnp.minimum(s * tiles_per_shard + j, num_tiles - 1), 0)

        def t_map(b, s, j):
            return (b, jnp.minimum(s * tiles_per_shard + j, num_tiles - 1), 0)

    kernel = functools.partial(
        _combined_loss_kernel, gamma=gamma, num_classes=C, tile_rows=tr,
        chunk_rows=chunk, tiles_per_shard=tiles_per_shard, num_pixels=P,
        mask_needed=mask_needed)

    acc_shape = jax.ShapeDtypeStruct((B, num_shards, chunk, _LANES), jnp.float32)
    acc_spec = pl.BlockSpec((1, 1, chunk, _LANES), lambda b, s, j: (b, s, 0, 0))

    # VMEM budget: double-buffered x/t tiles + resident accumulator slabs + slack.
    x_blk = C * tr * _LANES * x.dtype.itemsize
    t_blk = tr * _LANES * t.dtype.itemsize
    acc_blk = 3 * chunk * _LANES * 4
    vmem_limit = int(min(32 * 1024 * 1024,
                         max(2 * (x_blk + t_blk) + 2 * acc_blk + (4 << 20),
                             8 * 1024 * 1024)))

    facc, iacc, sacc = pl.pallas_call(
        kernel,
        out_shape=(acc_shape, acc_shape, acc_shape),
        grid_spec=pltpu.PrefetchScalarGridSpec(
            num_scalar_prefetch=0,
            grid=(B, num_shards, tiles_per_shard),
            in_specs=[
                # alpha: whole (C,) vector in SMEM, read as scalars in the kernel.
                pl.BlockSpec(memory_space=pltpu.MemorySpace.SMEM),
                pl.BlockSpec((1, C, tr, _LANES), x_map),
                pl.BlockSpec((1, tr, _LANES), t_map),
            ],
            out_specs=[acc_spec, acc_spec, acc_spec],
        ),
        compiler_params=pltpu.CompilerParams(
            # Batch and shard axes write disjoint output blocks -> parallel;
            # pixel-tile axis accumulates -> arbitrary (sequential).
            dimension_semantics=("parallel", "parallel", "arbitrary"),
            vmem_limit_bytes=vmem_limit,
        ),
    )(alpha, x, t)

    return jnp.sum(facc), jnp.sum(iacc), jnp.sum(sacc)


def pixelwise_focal_loss(inputs, targets, alpha=None, gamma=2, reduction="mean",
                         max_tile_rows=None):
    """inputs: (B,C,H,W) float (f32 or bf16), targets: (B,H,W) int, alpha: (C,) or None."""
    B, C, H, W = inputs.shape
    if alpha is None:
        alpha = jnp.ones((C,), jnp.float32)   # equivalent to no alpha weighting
    if reduction not in ("mean", "sum"):
        # TODO(synk): 'none' reduction (per-pixel focal map) is not implemented.
        raise NotImplementedError("only 'mean' and 'sum' reductions supported")
    focal_sum, _, _ = _combined_partial_sums(inputs, targets, alpha, gamma, max_tile_rows)
    if reduction == "mean":
        return focal_sum / jnp.float32(B * H * W)
    return focal_sum


def combined_loss(inputs, targets, alpha=None, gamma=2, reduction="mean",
                  dice_weight=1.0, focal_weight=1.0, max_tile_rows=None):
    """Forward pass of the PyTorch CombinedLoss module."""
    B, C, H, W = inputs.shape
    if alpha is None:
        alpha = jnp.ones((C,), jnp.float32)
    if reduction not in ("mean", "sum"):
        # TODO(synk): 'none' reduction not supported (see pixelwise_focal_loss).
        raise NotImplementedError("only 'mean' and 'sum' reductions supported")

    focal_sum, intersection, input_sum = _combined_partial_sums(
        inputs, targets, alpha, gamma, max_tile_rows)

    n = jnp.float32(B * H * W)
    focal = focal_sum / n if reduction == "mean" else focal_sum

    smooth = jnp.float32(1.0)
    # sum(one_hot(targets)) == number of pixels (assumes every target is in [0, C)).
    dice = 1.0 - (2.0 * intersection + smooth) / (input_sum + n + smooth)

    return focal_weight * focal + dice_weight * dice


def _reference_combined(inputs, targets, alpha, gamma=2, reduction="mean",
                        dice_weight=1.0, focal_weight=1.0):
    inputs = inputs.astype(jnp.float32)
    C = inputs.shape[1]
    oh = jax.nn.one_hot(targets, C, dtype=jnp.float32).transpose(0, 3, 1, 2)
    pt = jnp.sum(inputs * oh, axis=1)
    log_pt = jnp.log(pt + 1e-10)
    focal = -((1.0 - pt) ** gamma) * log_pt
    if alpha is not None:
        focal = alpha[targets] * focal
    focal_loss = jnp.mean(focal) if reduction == "mean" else jnp.sum(focal)
    inter = jnp.sum(inputs * oh)
    dice = 1.0 - (2.0 * inter + 1.0) / (jnp.sum(inputs) + jnp.sum(oh) + 1.0)
    return focal_weight * focal_loss + dice_weight * dice


if __name__ == "__main__":
    key = jax.random.PRNGKey(0)
    k1, k2, k3, k4, k5, k6 = jax.random.split(key, 6)

    def make_case(kx, kt, B, C, H, W, dtype=jnp.float32):
        logits = jax.random.normal(kx, (B, C, H, W), dtype=jnp.float32)
        # The PyTorch module takes log(pt) of the inputs directly, so feed
        # softmax-normalized per-class probabilities.
        inputs = jax.nn.softmax(logits, axis=1).astype(dtype)
        targets = jax.random.randint(kt, (B, H, W), 0, C, dtype=jnp.int32)
        return inputs, targets

    # 1) Small aligned shape (H*W % 128 == 0), f32 path — exact match.
    inputs, targets = make_case(k1, k2, 2, 4, 16, 16)
    alpha = jnp.arange(1, 5, dtype=jnp.float32)
    loss = jax.block_until_ready(combined_loss(inputs, targets, alpha=alpha, gamma=2))
    ref = _reference_combined(inputs, targets, alpha, gamma=2)
    assert jnp.allclose(loss, ref, rtol=1e-5, atol=1e-6), (loss, ref)

    # 2) bf16-input path (halves x HBM traffic; kernel upcasts after load).
    loss_bf16 = jax.block_until_ready(
        combined_loss(inputs.astype(jnp.bfloat16), targets, alpha=alpha, gamma=2))
    ref_bf16 = _reference_combined(inputs.astype(jnp.bfloat16), targets, alpha, gamma=2)
    assert jnp.allclose(loss_bf16, ref_bf16, rtol=1e-3, atol=1e-4), (loss_bf16, ref_bf16)

    # 3) Ragged H*W (not a multiple of 128): exercises the in-kernel tail mask.
    inputs_r, targets_r = make_case(k3, k4, 2, 3, 10, 13)
    loss_r = jax.block_until_ready(combined_loss(inputs_r, targets_r, alpha=None, gamma=2))
    ref_r = _reference_combined(inputs_r, targets_r, None, gamma=2)
    assert jnp.allclose(loss_r, ref_r, rtol=1e-5, atol=1e-6), (loss_r, ref_r)

    # 4) Multi-tile + 2-shard path with an odd tile count (forced small tiles):
    #    exercises the phantom-tile clamp and the ragged last tile together.
    inputs_m, targets_m = make_case(k5, k6, 1, 3, 144, 144)
    alpha_m = jnp.array([0.5, 1.0, 2.0], jnp.float32)
    ref_m = _reference_combined(inputs_m, targets_m, alpha_m, gamma=2)
    loss_m64 = jax.block_until_ready(
        combined_loss(inputs_m, targets_m, alpha=alpha_m, gamma=2, max_tile_rows=64))
    assert jnp.allclose(loss_m64, ref_m, rtol=1e-5, atol=1e-6), (loss_m64, ref_m)
    # 5) Same data, larger tile -> exercises the in-kernel chunk fori_loop.
    loss_m128 = jax.block_until_ready(
        combined_loss(inputs_m, targets_m, alpha=alpha_m, gamma=2, max_tile_rows=128))
    assert jnp.allclose(loss_m128, ref_m, rtol=1e-5, atol=1e-6), (loss_m128, ref_m)

    print("KERNEL_OK")
</pallas_src>

<mosaic_0001>
module attributes {stable_mosaic.version = 11 : i64} {
  func.func @_combined_loss_kernel(%arg0: i32, %arg1: i32, %arg2: i32, %arg3: memref<4xf32, #tpu.memory_space<smem>>, %arg4: memref<1x4x2x128xf32, #tpu.memory_space<vmem>>, %arg5: memref<1x2x128xi8, #tpu.memory_space<vmem>>, %arg6: memref<1x1x2x128xf32, #tpu.memory_space<vmem>>, %arg7: memref<1x1x2x128xf32, #tpu.memory_space<vmem>>, %arg8: memref<1x1x2x128xf32, #tpu.memory_space<vmem>>) attributes {dimension_semantics = [#tpu.dimension_semantics<parallel>, #tpu.dimension_semantics<parallel>, #tpu.dimension_semantics<arbitrary>], iteration_bounds = array<i64: 2, 1, 1>, scalar_prefetch = 0 : i64, scratch_operands = 0 : i64, tpu.core_type = #tpu.core_type<tc>, window_params = [{transform_indices = @transform_0, window_bounds = array<i64: 4>}, {transform_indices = @transform_1, window_bounds = array<i64: 1, 4, 2, 128>}, {transform_indices = @transform_2, window_bounds = array<i64: 1, 2, 128>}, {transform_indices = @transform_3, window_bounds = array<i64: 1, 1, 2, 128>}, {transform_indices = @transform_4, window_bounds = array<i64: 1, 1, 2, 128>}, {transform_indices = @transform_5, window_bounds = array<i64: 1, 1, 2, 128>}]} {
    %c0_i32 = arith.constant 0 : i32
    %0 = arith.cmpi eq, %arg2, %c0_i32 : i32
    %1 = arith.extui %0 : i1 to i32
    %c0_i32_0 = arith.constant 0 : i32
    %2 = arith.cmpi ne, %1, %c0_i32_0 : i32
    scf.if %2 {
      %cst_49 = arith.constant 0.000000e+00 : f32
      %71 = vector.broadcast %cst_49 : f32 to vector<1x1x2x128xf32>
      %c0_50 = arith.constant 0 : index
      %c0_51 = arith.constant 0 : index
      %c0_52 = arith.constant 0 : index
      %c0_53 = arith.constant 0 : index
      %72 = vector.load %arg6[%c0_50, %c0_51, %c0_52, %c0_53] : memref<1x1x2x128xf32, #tpu.memory_space<vmem>>, vector<1x1x2x128xf32>
      tpu.vector_store %arg6[%c0_50, %c0_51, %c0_52, %c0_53], %71 {strides = array<i32>} : memref<1x1x2x128xf32, #tpu.memory_space<vmem>>, vector<1x1x2x128xf32>,
      %cst_54 = arith.constant 0.000000e+00 : f32
      %73 = vector.broadcast %cst_54 : f32 to vector<1x1x2x128xf32>
      %c0_55 = arith.constant 0 : index
      %c0_56 = arith.constant 0 : index
      %c0_57 = arith.constant 0 : index
      %c0_58 = arith.constant 0 : index
      %74 = vector.load %arg7[%c0_55, %c0_56, %c0_57, %c0_58] : memref<1x1x2x128xf32, #tpu.memory_space<vmem>>, vector<1x1x2x128xf32>
      tpu.vector_store %arg7[%c0_55, %c0_56, %c0_57, %c0_58], %73 {strides = array<i32>} : memref<1x1x2x128xf32, #tpu.memory_space<vmem>>, vector<1x1x2x128xf32>,
      %cst_59 = arith.constant 0.000000e+00 : f32
      %75 = vector.broadcast %cst_59 : f32 to vector<1x1x2x128xf32>
      %c0_60 = arith.constant 0 : index
      %c0_61 = arith.constant 0 : index
      %c0_62 = arith.constant 0 : index
      %c0_63 = arith.constant 0 : index
      %76 = vector.load %arg8[%c0_60, %c0_61, %c0_62, %c0_63] : memref<1x1x2x128xf32, #tpu.memory_space<vmem>>, vector<1x1x2x128xf32>
      tpu.vector_store %arg8[%c0_60, %c0_61, %c0_62, %c0_63], %75 {strides = array<i32>} : memref<1x1x2x128xf32, #tpu.memory_space<vmem>>, vector<1x1x2x128xf32>,
    } else {
    }
    %c0 = arith.constant 0 : index
    %3 = memref.load %arg3[%c0] : memref<4xf32, #tpu.memory_space<smem>>
    %c1 = arith.constant 1 : index
    %4 = memref.load %arg3[%c1] : memref<4xf32, #tpu.memory_space<smem>>
    %c2 = arith.constant 2 : index
    %5 = memref.load %arg3[%c2] : memref<4xf32, #tpu.memory_space<smem>>
    %c3 = arith.constant 3 : index
    %6 = memref.load %arg3[%c3] : memref<4xf32, #tpu.memory_space<smem>>
    %c0_1 = arith.constant 0 : index
    %c0_2 = arith.constant 0 : index
    %c0_3 = arith.constant 0 : index
    %7 = vector.load %arg5[%c0_1, %c0_2, %c0_3] : memref<1x2x128xi8, #tpu.memory_space<vmem>>, vector<1x2x128xi8>
    %8 = vector.shape_cast %7 : vector<1x2x128xi8> to vector<2x128xi8>
    %9 = arith.extsi %8 : vector<2x128xi8> to vector<2x128xi32>
    %cst = arith.constant 0.000000e+00 : f32
    %10 = vector.broadcast %cst : f32 to vector<2x128xf32>
    %cst_4 = arith.constant 0.000000e+00 : f32
    %11 = vector.broadcast %cst_4 : f32 to vector<2x128xf32>
    %c0_5 = arith.constant 0 : index
    %c0_6 = arith.constant 0 : index
    %c0_7 = arith.constant 0 : index
    %c0_8 = arith.constant 0 : index
    %12 = vector.load %arg4[%c0_5, %c0_6, %c0_7, %c0_8] : memref<1x4x2x128xf32, #tpu.memory_space<vmem>>, vector<1x1x2x128xf32>
    %13 = vector.shape_cast %12 : vector<1x1x2x128xf32> to vector<2x128xf32>
    %c0_i32_9 = arith.constant 0 : i32
    %14 = vector.broadcast %c0_i32_9 : i32 to vector<2x128xi32>
    %15 = arith.cmpi eq, %9, %14 : vector<2x128xi32>
    %16 = arith.select %15, %13, %10 : vector<2x128xi1>, vector<2x128xf32>
    %17 = vector.broadcast %3 : f32 to vector<2x128xf32>
    %18 = arith.select %15, %17, %11 : vector<2x128xi1>, vector<2x128xf32>
    %c0_10 = arith.constant 0 : index
    %c1_11 = arith.constant 1 : index
    %c0_12 = arith.constant 0 : index
    %c0_13 = arith.constant 0 : index
    %19 = vector.load %arg4[%c0_10, %c1_11, %c0_12, %c0_13] : memref<1x4x2x128xf32, #tpu.memory_space<vmem>>, vector<1x1x2x128xf32>
    %20 = vector.shape_cast %19 : vector<1x1x2x128xf32> to vector<2x128xf32>
    %c1_i32 = arith.constant 1 : i32
    %21 = vector.broadcast %c1_i32 : i32 to vector<2x128xi32>
    %22 = arith.cmpi eq, %9, %21 : vector<2x128xi32>
    %23 = arith.select %22, %20, %16 : vector<2x128xi1>, vector<2x128xf32>
    %24 = vector.broadcast %4 : f32 to vector<2x128xf32>
    %25 = arith.select %22, %24, %18 : vector<2x128xi1>, vector<2x128xf32>
    %26 = arith.addf %13, %20 : vector<2x128xf32>
    %c0_14 = arith.constant 0 : index
    %c2_15 = arith.constant 2 : index
    %c0_16 = arith.constant 0 : index
    %c0_17 = arith.constant 0 : index
    %27 = vector.load %arg4[%c0_14, %c2_15, %c0_16, %c0_17] : memref<1x4x2x128xf32, #tpu.memory_space<vmem>>, vector<1x1x2x128xf32>
    %28 = vector.shape_cast %27 : vector<1x1x2x128xf32> to vector<2x128xf32>
    %c2_i32 = arith.constant 2 : i32
    %29 = vector.broadcast %c2_i32 : i32 to vector<2x128xi32>
    %30 = arith.cmpi eq, %9, %29 : vector<2x128xi32>
    %31 = arith.select %30, %28, %23 : vector<2x128xi1>, vector<2x128xf32>
    %32 = vector.broadcast %5 : f32 to vector<2x128xf32>
    %33 = arith.select %30, %32, %25 : vector<2x128xi1>, vector<2x128xf32>
    %34 = arith.addf %26, %28 : vector<2x128xf32>
    %c0_18 = arith.constant 0 : index
    %c3_19 = arith.constant 3 : index
    %c0_20 = arith.constant 0 : index
    %c0_21 = arith.constant 0 : index
    %35 = vector.load %arg4[%c0_18, %c3_19, %c0_20, %c0_21] : memref<1x4x2x128xf32, #tpu.memory_space<vmem>>, vector<1x1x2x128xf32>
    %36 = vector.shape_cast %35 : vector<1x1x2x128xf32> to vector<2x128xf32>
    %c3_i32 = arith.constant 3 : i32
    %37 = vector.broadcast %c3_i32 : i32 to vector<2x128xi32>
    %38 = arith.cmpi eq, %9, %37 : vector<2x128xi32>
    %39 = arith.select %38, %36, %31 : vector<2x128xi1>, vector<2x128xf32>
    %40 = vector.broadcast %6 : f32 to vector<2x128xf32>
    %41 = arith.select %38, %40, %33 : vector<2x128xi1>, vector<2x128xf32>
    %42 = arith.addf %34, %36 : vector<2x128xf32>
    %cst_22 = arith.constant 1.000000e-10 : f32
    %43 = vector.broadcast %cst_22 : f32 to vector<2x128xf32>
    %44 = arith.addf %39, %43 : vector<2x128xf32>
    %45 = math.log %44 : vector<2x128xf32>
    %cst_23 = arith.constant 0.000000e+00 : f32
    %46 = vector.broadcast %cst_23 : f32 to vector<2x128xf32>
    %47 = arith.subf %46, %41 : vector<2x128xf32>
    %cst_24 = arith.constant 1.000000e+00 : f32
    %48 = vector.broadcast %cst_24 : f32 to vector<2x128xf32>
    %49 = arith.subf %48, %39 : vector<2x128xf32>
    %50 = arith.mulf %49, %49 : vector<2x128xf32>
    %51 = arith.mulf %47, %50 : vector<2x128xf32>
    %52 = arith.mulf %51, %45 : vector<2x128xf32>
    %c0_25 = arith.constant 0 : index
    %c0_26 = arith.constant 0 : index
    %c0_27 = arith.constant 0 : index
    %c0_28 = arith.constant 0 : index
    %53 = vector.load %arg6[%c0_25, %c0_26, %c0_27, %c0_28] : memref<1x1x2x128xf32, #tpu.memory_space<vmem>>, vector<1x1x2x128xf32>
    %54 = vector.shape_cast %53 : vector<1x1x2x128xf32> to vector<2x128xf32>
    %55 = arith.addf %54, %52 : vector<2x128xf32>
    %c0_29 = arith.constant 0 : index
    %c0_30 = arith.constant 0 : index
    %c0_31 = arith.constant 0 : index
    %c0_32 = arith.constant 0 : index
    %56 = vector.load %arg6[%c0_29, %c0_30, %c0_31, %c0_32] : memref<1x1x2x128xf32, #tpu.memory_space<vmem>>, vector<1x1x2x128xf32>
    %57 = vector.shape_cast %56 : vector<1x1x2x128xf32> to vector<2x128xf32>
    %58 = vector.shape_cast %55 : vector<2x128xf32> to vector<1x1x2x128xf32>
    tpu.vector_store %arg6[%c0_29, %c0_30, %c0_31, %c0_32], %58 {strides = array<i32>} : memref<1x1x2x128xf32, #tpu.memory_space<vmem>>, vector<1x1x2x128xf32>,
    %c0_33 = arith.constant 0 : index
    %c0_34 = arith.constant 0 : index
    %c0_35 = arith.constant 0 : index
    %c0_36 = arith.constant 0 : index
    %59 = vector.load %arg7[%c0_33, %c0_34, %c0_35, %c0_36] : memref<1x1x2x128xf32, #tpu.memory_space<vmem>>, vector<1x1x2x128xf32>
    %60 = vector.shape_cast %59 : vector<1x1x2x128xf32> to vector<2x128xf32>
    %61 = arith.addf %60, %39 : vector<2x128xf32>
    %c0_37 = arith.constant 0 : index
    %c0_38 = arith.constant 0 : index
    %c0_39 = arith.constant 0 : index
    %c0_40 = arith.constant 0 : index
    %62 = vector.load %arg7[%c0_37, %c0_38, %c0_39, %c0_40] : memref<1x1x2x128xf32, #tpu.memory_space<vmem>>, vector<1x1x2x128xf32>
    %63 = vector.shape_cast %62 : vector<1x1x2x128xf32> to vector<2x128xf32>
    %64 = vector.shape_cast %61 : vector<2x128xf32> to vector<1x1x2x128xf32>
    tpu.vector_store %arg7[%c0_37, %c0_38, %c0_39, %c0_40], %64 {strides = array<i32>} : memref<1x1x2x128xf32, #tpu.memory_space<vmem>>, vector<1x1x2x128xf32>,
    %c0_41 = arith.constant 0 : index
    %c0_42 = arith.constant 0 : index
    %c0_43 = arith.constant 0 : index
    %c0_44 = arith.constant 0 : index
    %65 = vector.load %arg8[%c0_41, %c0_42, %c0_43, %c0_44] : memref<1x1x2x128xf32, #tpu.memory_space<vmem>>, vector<1x1x2x128xf32>
    %66 = vector.shape_cast %65 : vector<1x1x2x128xf32> to vector<2x128xf32>
    %67 = arith.addf %66, %42 : vector<2x128xf32>
    %c0_45 = arith.constant 0 : index
    %c0_46 = arith.constant 0 : index
    %c0_47 = arith.constant 0 : index
    %c0_48 = arith.constant 0 : index
    %68 = vector.load %arg8[%c0_45, %c0_46, %c0_47, %c0_48] : memref<1x1x2x128xf32, #tpu.memory_space<vmem>>, vector<1x1x2x128xf32>
    %69 = vector.shape_cast %68 : vector<1x1x2x128xf32> to vector<2x128xf32>
    %70 = vector.shape_cast %67 : vector<2x128xf32> to vector<1x1x2x128xf32>
    tpu.vector_store %arg8[%c0_45, %c0_46, %c0_47, %c0_48], %70 {strides = array<i32>} : memref<1x1x2x128xf32, #tpu.memory_space<vmem>>, vector<1x1x2x128xf32>,
    return
  }
  func.func @transform_0(%arg0: i32, %arg1: i32, %arg2: i32) -> i32 {
    %c0_i32 = arith.constant 0 : i32
    %c0_i32_0 = arith.constant 0 : i32
    return %c0_i32 : i32
  }
  func.func @transform_1(%arg0: i32, %arg1: i32, %arg2: i32) -> (i32, i32, i32, i32) {
    %c1_i32 = arith.constant 1 : i32
    %0 = arith.muli %arg1, %c1_i32 : i32
    %1 = arith.addi %0, %arg2 : i32
    %c0_i32 = arith.constant 0 : i32
    %c0_i32_0 = arith.constant 0 : i32
    %c0_i32_1 = arith.constant 0 : i32
    return %arg0, %c0_i32, %1, %c0_i32_0 : i32, i32, i32, i32
  }
  func.func @transform_2(%arg0: i32, %arg1: i32, %arg2: i32) -> (i32, i32, i32) {
    %c1_i32 = arith.constant 1 : i32
    %0 = arith.muli %arg1, %c1_i32 : i32
    %1 = arith.addi %0, %arg2 : i32
    %c0_i32 = arith.constant 0 : i32
    %c0_i32_0 = arith.constant 0 : i32
    return %arg0, %1, %c0_i32 : i32, i32, i32
  }
  func.func @transform_3(%arg0: i32, %arg1: i32, %arg2: i32) -> (i32, i32, i32, i32) {
    %c0_i32 = arith.constant 0 : i32
    %c0_i32_0 = arith.constant 0 : i32
    %c0_i32_1 = arith.constant 0 : i32
    return %arg0, %arg1, %c0_i32, %c0_i32_0 : i32, i32, i32, i32
  }
  func.func @transform_4(%arg0: i32, %arg1: i32, %arg2: i32) -> (i32, i32, i32, i32) {
    %c0_i32 = arith.constant 0 : i32
    %c0_i32_0 = arith.constant 0 : i32
    %c0_i32_1 = arith.constant 0 : i32
    return %arg0, %arg1, %c0_i32, %c0_i32_0 : i32, i32, i32, i32
  }
  func.func @transform_5(%arg0: i32, %arg1: i32, %arg2: i32) -> (i32, i32, i32, i32) {
    %c0_i32 = arith.constant 0 : i32
    %c0_i32_0 = arith.constant 0 : i32
    %c0_i32_1 = arith.constant 0 : i32
    return %arg0, %arg1, %c0_i32, %c0_i32_0 : i32, i32, i32, i32
  }
}

</mosaic_0001>

<bundles_post_ra>
// kernel: tpu_custom_call.1
= control target key start
LH: loop header
LB: loop body
LE: loop exit
PB: predicated region body
PF: predicated region fallthrough
CT: control target
= control target key end

     0   :  { %s1282_s0 = inlined_call_operand.hbm [shape: f32[4], index: 0, kind: input, shape index: {}]   ;;  %s1283_s1 = inlined_call_operand.hbm [shape: f32[2,4,2,128], index: 1, kind: input, shape index: {}]   ;;  %s1284_s2 = inlined_call_operand.vmem [shape: s8[2,2,128], index: 2, kind: input, shape index: {}]   ;;  %s1285_s3 = inlined_call_operand.hbm [shape: f32[2,1,2,128], index: 3, kind: output, shape index: {0}]   ;;  %s1286_s4 = inlined_call_operand.hbm [shape: f32[2,1,2,128], index: 4, kind: output, shape index: {1}]   ;;  %s1287_s5 = inlined_call_operand.hbm [shape: f32[2,1,2,128], index: 5, kind: output, shape index: {2}]  }
   0x1   :  { %1292 = sst [smem:[#allocation15_spill]] %s1282_s0 }
   0x2   :  { %11 = vsyncpa [#allocation5], 0 }
   0x3   :  { %12 = vsyncpa [#allocation3], 0 }
   0x4   :  { %14 = vsyncpa [#allocation3 + $0x1], 0 }
   0x5   :  { %15 = vsyncpa [#allocation4], 0 }
   0x6   :  { %17 = vsyncpa [#allocation4 + $0x1], 0 }
   0x7   :  { %18 = vsyncpa [#allocation9], 0 }
   0x8   :  { %20 = vsyncpa [#allocation9 + $0x1], 0  ;;  %s964_s18 = smov 0   ;;  %s966_s19 = smov 0  }
   0x9   :  { %s968_s20 = smov 0   ;;  %s970_s21 = smov 0  }
   0xa   :  { %s972_s22 = smov 0   ;;  %s974_s23 = smov 0  }
   0xb LB: > { %s995_s24 = sadd.s32 4294967295, %s924_s23   ;;  %s1289_s25 = sadd.s32 4294967294, %s924_s23   ;;  %s924_s23 = sphi %s974_s23, %s26_s23   ;;  %s920_s22 = sphi %s972_s22, %s1312_s22   ;;  %s916_s21 = sphi %s970_s21, %s1311_s21   ;;  %s912_s20 = sphi %s968_s20, %s1310_s20   ;;  %s908_s19 = sphi %s966_s19, %s1309_s19   ;;  %s904_s18 = sphi %s964_s18, %s1308_s18  }
   0xc   : > { %p84_p0 = scmp.ne.s32.totalorder %s912_s20, %s908_s19  ;;  %p85_p1 = scmp.eq.s32.totalorder %s924_s23, 0 }
   0xd   : > { %p90_p2 = scmp.ne.s32.totalorder %s908_s19, %s904_s18  ;;  %p1288_p3 = scmp.eq.s32.totalorder %s995_s24, 0 }
   0xe   : > { %p146_p4 = scmp.eq.s32.totalorder %s995_s24, 1  ;;  %p86_p5 = por %p85_p1, %p84_p0 }
   0xf   : > { %p152_p6 = scmp.eq.s32.totalorder %s1289_s25, 1  ;;  %p1010_p7 = por %p1288_p3, %p90_p2 }
  0x10   : > { %p1014_p8 = por %p146_p4, %p84_p0  ;;  %p620_p10 = scmp.ge.s32.totalorder %s924_s23, 1 }
  0x11   : > { %s1293_s27 = scalar_select %p1010_p7, 1, 0 }
  0x12   : > { %s1294_s28 = scalar_select %p1014_p8, 1, 0 }
  0x13   : > { %p1018_p9 = por %p152_p6, %p90_p2  ;;  %p215_p11 = scmp.lt.s32.totalorder %s924_s23, 3 }
  0x14   : > { %p678_p1 = scmp.lt.s32.totalorder %s924_s23, 2  ;;  %s237_s6 = sand.u32 1, %s912_s20  }
  0x15   : > { %s1295_s29 = scalar_select %p1018_p9, 1, 0 }
  0x16   : > { %p1025_p13 = pnand %p620_p10, %p215_p11  ;;  %p1033_p0 = pnand %p678_p1, %p86_p5 }
  0x17   : > { %p1298_p2 = scmp.eq.s32.totalorder %s995_s24, 0  ;;  %s45_s8 = sadd.s32 1, %s920_s22 }
  0x18   : > { %p659_p3 = pneg %p1025_p13  ;;  %s623_s9 = sshll.u32 %s237_s6, 3 }
  0x19   : > { %p47_p6 = scmp.ge.s32.totalorder %s45_s8, 2  ;;  %s1299_s0 = sld [smem:[#allocation15_spill]] }
  0x1a   : > { %p660_p4 = pnand %p659_p3, %p1298_p2 }
  0x1c   : > { %p737_p11 = pneg %p660_p4 }
  0x1f   : > { %s735_s12 = scalar_lea.hbm %s1299_s0, 16 }
  0x20   : > { %p736_p10 = scmp.ne.s32.totalorder %s1299_s0, %s735_s12  ;;  %p742_p5 = scmp.lt.u32.totalorder %s735_s12, %s1299_s0 }
  0x22   : > { %p738_p12 = pnand %p737_p11, %p736_p10 }
  0x24   : > { %p739_p9 = pneg %p738_p12 }
  0x26   : > { %p744_p1 = pnand %p742_p5, %p739_p9 }
  0x28   : > { %747 = shalt.err (!%p744_p1)
}
  0x29   : > { %s926_s17 = smov [#allocation2]   ;;  %s1314_s8 = smov (%p47_p6, %s45_s8), 0 }
  0x2a   : > { %662 = dma.hbm_to_smem (!%p660_p4), %s1299_s0, 16, %s926_s17, [#allocation5]  }
  0x2b   : > { %s646_s10 = sshll.u32 %s920_s22, 7  ;;  %s72_s11 = ssub.s32 %s920_s22, %s1314_s8 }
  0x2c   : > { %s1060_s14 = scalar_lea.hbm %s1283_s1, %s646_s10  ;;  %p75_p3 = scmp.eq.s32.totalorder %s72_s11, 0 }
  0x2d   : > { %s241_s25 = scalar_lea.vmem [#allocation6], %s623_s9  ;;  %s1300_s15 = sadd.s32 1, %s912_s20 }
  0x2e   : > { %s250_s26 = sshll.u32 %s241_s25, 4  ;;  %s1069_s17 = scalar_lea.sflag [#allocation3], %s237_s6  ;;  %s1062_s26 = int_to_ptr.vmem [resolvable:$true] %s250_s26 }
  0x2f   : > { %s1067_s16 = scalar_select %p75_p3, %s912_s20, %s1300_s15  }
  0x30   : > { %s748_s0 = scalar_lea.hbm %s1060_s14, 128  ;;  %p750_p12 = pneg %p1033_p0 }
  0x31   : > { %p749_p9 = scmp.ne.s32.totalorder %s1060_s14, %s748_s0  ;;  %s753_s9 = scalar_lea.hbm %s1283_s1, 256 }
  0x32   : > { %p754_p6 = scmp.lt.u32.totalorder %s1060_s14, %s1283_s1  ;;  %p755_p10 = scmp.lt.u32.totalorder %s753_s9, %s748_s0 }
  0x33   : > { %p751_p2 = pnand %p750_p12, %p749_p9  ;;  %p757_p5 = scmp.lt.u32.totalorder %s748_s0, %s1060_s14 }
  0x34   : > { %p756_p11 = por %p755_p10, %p754_p6 }
  0x35   : > { %p752_p4 = pneg %p751_p2 }
  0x36   : > { %p758_p1 = por %p757_p5, %p756_p11 }
  0x38   : > { %p759_p3 = pnand %p758_p1, %p752_p4 }
  0x3a   : > { %762 = shalt.err (!%p759_p3)
}
  0x3b   : > { %s763_s6 = scalar_lea.vmem %s1062_s26, 128  ;;  %s927_s25 = smov [#allocation6]  }
  0x3c   : > { %p764_p9 = scmp.ne.s32.totalorder %s1062_s26, %s763_s6  ;;  %s768_s15 = sshll.u32 %s927_s25, 4  ;;  %s769_s15 = int_to_ptr.vmem [resolvable:$false] %s768_s15 }
  0x3d   : > { %s770_s10 = scalar_lea.vmem %s769_s15, 256  ;;  %p771_p7 = scmp.lt.s32.totalorder %s1062_s26, %s769_s15 }
  0x3e   : > { %p766_p2 = pnand %p764_p9, %p750_p12  ;;  %p772_p6 = scmp.lt.s32.totalorder %s770_s10, %s763_s6 }
  0x40   : > { %p767_p8 = pneg %p766_p2  ;;  %p773_p10 = por %p772_p6, %p771_p7 }
  0x42   : > { %p774_p11 = pnand %p773_p10, %p767_p8 }
  0x44   : > { %777 = shalt.err (!%p774_p11)
}
  0x45   : > { %s928_s0 = smov 32   ;;  %s929_s13 = smov 2  }
  0x46   : > { %666 = dma.hbm_to_vmem [thread:$0]  (!%p1033_p0), %s1060_s14, 128, %s1062_s26, %s1069_s17, %s928_s0, %s928_s0, %s929_s13  }
  0x47   : > { %273 = sbr.rel (%p1025_p13) target bundleno = 165 (0xa5), region = 32  ;;  %p1301_p12 = scmp.eq.s32.totalorder (!%p1025_p13), %s995_s24, 0 }
  0x4e   : > { %887 = dma.done.wait (%p1301_p12), [#allocation5], 16   ;;  %p1302_p4 = pmov %p1301_p12 }
  0x4f   : > { %s1104_s9 = sand.u32 1, %s908_s19   ;;  %p1303_p7 = scmp.ne.s32.totalorder %s1293_s27, 0 }
  0x50   : > { %889 = vsyncadd (%p1302_p4), [#allocation5], 4294967280  ;;  %s628_s11 = sshll.u32 %s1104_s9, 3  ;;  %s280_s12 = scalar_lea.sflag [#allocation3], %s1104_s9 }
  0x51   : > { %s283_s6 = scalar_lea.vmem [#allocation6], %s628_s11 }
  0x52   : > { %891 = dma.done.wait (%p1303_p7), %s280_s12, 128  }
  0x53   : > { %893 = vsyncadd (%p1303_p7), %s280_s12, 4294967168 }
  0x54   : > { %288 = sfence }
  0x55   : > { %s629_s30 = sshll.u32 %s1104_s9, 1  ;;  %p330_p8 = scmp.lt.s32.totalorder %s916_s21, 1  ;;  %v350_v0 = vld [vmem:[%s283_s6] sm:$0x3]  ;;  %v635_v1 = vld [vmem:[%s283_s6 + $0x2] sm:$0x3] }
  0x56   : > { %s1114_s7 = scalar_lea.vmem [#allocation8], %s629_s30  ;;  %v930_v2 = vmov 0.0   ;;  %s1117_s14 = scalar_lea.vmem [#allocation7], %s629_s30  ;;  %v361_v3 = vadd.f32 %v635_v1, %v350_v0  ;;  %v636_v4 = vld [vmem:[%s283_s6 + $0x4] sm:$0x3] }
  0x57   : > { %342 = vst [vmem:[%s1114_s7] sm:$0x3] %v930_v2  ;;  %341 = vst [vmem:[%s1117_s14] sm:$0x3] %v930_v2  ;;  %s344_s26 = sld [smem:[#allocation2]]  ;;  %s1120_s27 = scalar_lea.vmem [#allocation10], %s629_s30  ;;  %v637_v7 = vld [vmem:[%s283_s6 + $0x6] sm:$0x3] }
  0x58   : > { %343 = vst [vmem:[%s1120_s27] sm:$0x3] %v930_v2  ;;  %s331_s17 = scalar_select %p330_p8, %s916_s21, 1  ;;  %v368_v5 = vadd.f32 %v636_v4, %v361_v3 }
  0x59   : > { %s632_s25 = sld [smem:[#allocation2 + $0x1]]  ;;  %s1124_s15 = sld [smem:[#allocation2 + $0x2]] }
  0x5a   : > { %s335_s13 = scalar_lea.vmem %s1284_s2, %s331_s17  ;;  %s1131_s11 = sld [smem:[#allocation2 + $0x3]]  ;;  %v375_v9 = vadd.f32 %v637_v7, %v368_v5 }
  0x5b   : > { %v348_v6 = vld [vmem:[%s335_s13] sm:$0x1]  ;;  %s398_s12 = sand.u32 1, %s995_s24   ;;  %s1141_s6 = sshll.u32 %s916_s21, 5 }
  0x5c   : > { %v1129_v8 = vunpack.c.0.s8 %v348_v6  ;;  %s432_s30 = sshll.u32 %s1114_s7, 4  ;;  %s1159_s17 = scalar_lea.hbm %s1286_s4, %s1141_s6  ;;  %s1161_s30 = int_to_ptr.vmem [resolvable:$true] %s432_s30 }
  0x5d   : > { %v353_v10 = vstv %s344_s26  ;;  %s446_s26 = sshll.u32 %s1120_s27, 4  ;;  %s1176_s10 = scalar_lea.sflag [#allocation9], %s398_s12  ;;  %s1172_s26 = int_to_ptr.vmem [resolvable:$true] %s446_s26 }
  0x5e   : > { %vm351_vm0 = vcmp.eq.s32.totalorder %v1129_v8, 0  ;;  %vm357_vm1 = vcmp.eq.s32.totalorder %v1129_v8, 1  ;;  %vm364_vm2 = vcmp.eq.s32.totalorder %v1129_v8, 2  ;;  %vm371_vm3 = vcmp.eq.s32.totalorder %v1129_v8, 3  ;;  %v387_v16 = vld [vmem:[%s1114_s7] sm:$0x3] }
  0x5f   : > { %v352_v11 = vsel %vm351_vm0, %v350_v0, 0.0  ;;  %v354_v12 = vsel %vm351_vm0, %v353_v10, 0.0  ;;  %v359_v13 = vstv %s632_s25  ;;  %v390_v14 = vld [vmem:[%s1120_s27] sm:$0x3]  ;;  %v366_v20 = vstv %s1124_s15  ;;  %s1170_s15 = scalar_lea.hbm %s1287_s5, %s1141_s6  ;;  %s778_s0 = scalar_lea.vmem %s1161_s30, 32 }
  0x60   : > { %v358_v15 = vsel %vm357_vm1, %v635_v1, %v352_v11  ;;  %v391_v17 = vadd.f32 %v390_v14, %v375_v9  ;;  %v360_v19 = vsel %vm357_vm1, %v359_v13, %v354_v12  ;;  %v373_v25 = vstv %s1131_s11  ;;  %p779_p13 = scmp.ne.s32.totalorder %s1161_s30, %s778_s0  ;;  %p1304_p0 = scmp.ne.s32.totalorder %s1294_s28, 0 }
  0x61   : > { %v365_v18 = vsel %vm364_vm2, %v636_v4, %v358_v15  ;;  %v367_v24 = vsel %vm364_vm2, %v366_v20, %v360_v19  ;;  %s931_s13 = smov [#allocation8]  }
  0x62   : > { %v1150_v21 = vsel %vm371_vm3, %v637_v7, %v365_v18  ;;  %392 = vst [vmem:[%s1120_s27] sm:$0x3] %v391_v17  ;;  %p780_p5 = pnand %p779_p13, %p1304_p0  ;;  %s782_s11 = sshll.u32 %s931_s13, 4  ;;  %s783_s11 = int_to_ptr.vmem [resolvable:$false] %s782_s11 }
  0x63   : > { %v376_v22 = vadd.f32 1e-10, %v1150_v21  ;;  %v388_v23 = vadd.f32 %v387_v16, %v1150_v21  ;;  %v380_v26 = vsub.f32 1.0, %v1150_v21  ;;  %s784_s21 = scalar_lea.vmem %s783_s11, 64  ;;  %p785_p3 = scmp.lt.s32.totalorder %s1161_s30, %s783_s11 }
  0x64   : > { %p781_p1 = pneg %p780_p5  ;;  %p786_p9 = scmp.lt.s32.totalorder %s784_s21, %s778_s0 }
  0x65   : > { %733 = vlog2.f32 %v376_v22  ;;  %389 = vst [vmem:[%s1114_s7] sm:$0x3] %v388_v23 }
  0x66   : > { %p787_p2 = por %p786_p9, %p785_p3 }
  0x68   : > { %p788_p6 = pnand %p787_p2, %p781_p1 }
  0x6a   : > { %791 = shalt.err (!%p788_p6)
}
  0x6b   : > { %s792_s7 = scalar_lea.hbm %s1159_s17, 32  ;;  %s796_s25 = scalar_lea.hbm %s1286_s4, 64 }
  0x6c   : > { %p793_p10 = scmp.ne.s32.totalorder %s1159_s17, %s792_s7  ;;  %p797_p4 = scmp.lt.u32.totalorder %s1159_s17, %s1286_s4 }
  0x6d   : > { %p798_p7 = scmp.lt.u32.totalorder %s796_s25, %s792_s7  ;;  %p800_p13 = scmp.lt.u32.totalorder %s792_s7, %s1159_s17 }
  0x6e   : > { %p794_p11 = pnand %p793_p10, %p1304_p0 }
  0x6f   : > { %p799_p8 = por %p798_p7, %p797_p4 }
  0x70   : > { %p795_p12 = pneg %p794_p11 }
  0x71   : > { %p801_p5 = por %p800_p13, %p799_p8 }
  0x73   : > { %p802_p1 = pnand %p801_p5, %p795_p12 }
  0x75   : > { %805 = shalt.err (!%p802_p1)
}
  0x76   : > { %654 = dma.vmem_to_hbm [thread:$0]  (%p1304_p0), %s1161_s30, 32, %s1159_s17, %s1176_s10   ;;  %v374_v27 = vsel %vm371_vm3, %v373_v25, %v367_v24 }
  0x77   : > { %s806_s0 = scalar_lea.vmem %s1172_s26, 32  ;;  %s932_s11 = smov [#allocation10]  }
  0x78   : > { %p807_p3 = scmp.ne.s32.totalorder %s1172_s26, %s806_s0  ;;  %s810_s21 = sshll.u32 %s932_s11, 4  ;;  %s811_s21 = int_to_ptr.vmem [resolvable:$false] %s810_s21 }
  0x79   : > { %s812_s7 = scalar_lea.vmem %s811_s21, 64  ;;  %p813_p6 = scmp.lt.s32.totalorder %s1172_s26, %s811_s21 }
  0x7a   : > { %p808_p9 = pnand %p807_p3, %p1304_p0  ;;  %p814_p10 = scmp.lt.s32.totalorder %s812_s7, %s806_s0 }
  0x7c   : > { %p809_p2 = pneg %p808_p9  ;;  %p815_p11 = por %p814_p10, %p813_p6 }
  0x7e   : > { %p816_p12 = pnand %p815_p11, %p809_p2 }
  0x80   : > { %819 = shalt.err (!%p816_p12)
}
  0x81   : > { %s820_s30 = scalar_lea.hbm %s1170_s15, 32  ;;  %s824_s24 = scalar_lea.hbm %s1287_s5, 64 }
  0x82   : > { %p821_p4 = scmp.ne.s32.totalorder %s1170_s15, %s820_s30  ;;  %p825_p13 = scmp.lt.u32.totalorder %s1170_s15, %s1287_s5 }
  0x83   : > { %p826_p5 = scmp.lt.u32.totalorder %s824_s24, %s820_s30  ;;  %p828_p3 = scmp.lt.u32.totalorder %s820_s30, %s1170_s15 }
  0x84   : > { %p822_p7 = pnand %p821_p4, %p1304_p0 }
  0x85   : > { %p827_p1 = por %p826_p5, %p825_p13 }
  0x86   : > { %p823_p8 = pneg %p822_p7 }
  0x87   : > { %p829_p9 = por %p828_p3, %p827_p1 }
  0x89   : > { %p830_p2 = pnand %p829_p9, %p823_p8 }
  0x8b   : > { %833 = shalt.err (!%p830_p2)
}
  0x8c   : > { %655 = dma.vmem_to_hbm [thread:$0]  (%p1304_p0), %s1172_s26, 32, %s1170_s15, %s1176_s10   ;;  %v381_v28 = vmul.f32 %v380_v26, %v380_v26  ;;  %v379_v29 = vsub.f32 0.0, %v374_v27  ;;  %v734_v31 = vpop.eup %733  ;;  %v384_v33 = vld [vmem:[%s1117_s14] sm:$0x3] }
  0x8d   : > { %v378_v32 = vmul.f32 0.6931472, %v734_v31  ;;  %s418_s13 = sshll.u32 %s1117_s14, 4  ;;  %s1230_s21 = scalar_lea.hbm %s1285_s3, %s1141_s6  ;;  %s1232_s13 = int_to_ptr.vmem [resolvable:$true] %s418_s13 }
  0x8e   : > { %v382_v30 = vmul.f32 %v381_v28, %v379_v29  ;;  %s394_s26 = scalar_lea.sflag [#allocation4], %s1104_s9  ;;  %s834_s15 = scalar_lea.vmem %s1232_s13, 32 }
  0x8f   : > { %p835_p6 = scmp.ne.s32.totalorder %s1232_s13, %s834_s15  ;;  %s933_s10 = smov [#allocation7]  }
  0x90   : > { %v383_v34 = vmul.f32 %v382_v30, %v378_v32  ;;  %s838_s7 = sshll.u32 %s933_s10, 4  ;;  %s839_s7 = int_to_ptr.vmem [resolvable:$false] %s838_s7 }
  0x91   : > { %p836_p10 = pnand %p835_p6, %p1304_p0  ;;  %s840_s30 = scalar_lea.vmem %s839_s7, 64 }
  0x92   : > { %v385_v35 = vadd.f32 %v384_v33, %v383_v34  ;;  %p841_p12 = scmp.lt.s32.totalorder %s1232_s13, %s839_s7  ;;  %p842_p4 = scmp.lt.s32.totalorder %s840_s30, %s834_s15 }
  0x93   : > { %p837_p11 = pneg %p836_p10 }
  0x94   : > { %386 = vst [vmem:[%s1117_s14] sm:$0x3] %v385_v35  ;;  %p843_p7 = por %p842_p4, %p841_p12 }
  0x96   : > { %p844_p8 = pnand %p843_p7, %p837_p11 }
  0x98   : > { %847 = shalt.err (!%p844_p8)
}
  0x99   : > { %s848_s9 = scalar_lea.hbm %s1230_s21, 32  ;;  %s852_s17 = scalar_lea.hbm %s1285_s3, 64 }
  0x9a   : > { %p849_p13 = scmp.ne.s32.totalorder %s1230_s21, %s848_s9  ;;  %p853_p3 = scmp.lt.u32.totalorder %s1230_s21, %s1285_s3 }
  0x9b   : > { %p854_p9 = scmp.lt.u32.totalorder %s852_s17, %s848_s9  ;;  %p856_p6 = scmp.lt.u32.totalorder %s848_s9, %s1230_s21 }
  0x9c   : > { %p850_p5 = pnand %p849_p13, %p1304_p0 }
  0x9d   : > { %p855_p2 = por %p854_p9, %p853_p3 }
  0x9e   : > { %p851_p1 = pneg %p850_p5 }
  0x9f   : > { %p857_p10 = por %p856_p6, %p855_p2 }
  0xa1   : > { %p858_p11 = pnand %p857_p10, %p851_p1 }
  0xa3   : > { %861 = shalt.err (!%p858_p11)
}
  0xa4   : > { %653 = dma.vmem_to_hbm [thread:$0]  (%p1304_p0), %s1232_s13, 32, %s1230_s21, %s394_s26  }
  0xa5 PF: > { %s458_s25 = sand.u32 1, %s904_s18   ;;  %p1305_p12 = scmp.ne.s32.totalorder %s1295_s29, 0 }
  0xa6   : > { %p1306_p4 = scmp.ge.s32.totalorder %s924_s23, 2  ;;  %s459_s27 = scalar_lea.sflag [#allocation4], %s458_s25 }
  0xa8   : > { %p668_p7 = pnand %p1306_p4, %p1305_p12 }
  0xaa   : > { %895 = dma.done.wait (!%p668_p7), %s459_s27, 32  }
  0xab   : > { %897 = vsyncadd (!%p668_p7), %s459_s27, 4294967264  ;;  %s1307_s0 = sadd.s32 4294967294, %s924_s23  }
  0xac   : > { %s467_s11 = sand.u32 1, %s1307_s0  }
  0xad   : > { %s468_s15 = scalar_lea.sflag [#allocation9], %s467_s11 }
  0xae   : > { %899 = dma.done.wait (!%p668_p7), %s468_s15, 64  }
  0xaf   : > { %901 = vsyncadd (!%p668_p7), %s468_s15, 4294967232  ;;  %s26_s23 = sadd.s32 1, %s924_s23   ;;  %s1308_s18 = smov %s908_s19 }
  0xb0   : > { %p23_p0 = scmp.ge.s32.totalorder %s26_s23, 4   ;;  %s1309_s19 = smov %s912_s20 }
  0xb1   : > { %s1310_s20 = smov %s1067_s16  ;;  %s1311_s21 = smov %s920_s22 }
  0xb2   : > { %s1312_s22 = smov %s1314_s8  ;;  %25 = sbr.rel (!%p23_p0) target bundleno = 11 (0xb), region = 124 }
  0xb9   :  { %482 = vsyncpa [#allocation3], 1 }
  0xba   :  { %484 = vsyncpa [#allocation3 + $0x1], 1 }
  0xbb   :  { %485 = vsyncpa [#allocation4], 1 }
  0xbc   :  { %487 = vsyncpa [#allocation4 + $0x1], 1 }
  0xbd   :  { %488 = vsyncpa [#allocation9], 1 }
  0xbe   :  { %490 = vsyncpa [#allocation9 + $0x1], 1 }
  0xbf   :  { %491 = vsyncpa [#allocation5], 1 }
  0xc0   :  { %493 = vsyncpa [#allocation5 + $0x1], 1 }

</bundles_post_ra>
